<compile_context>
chip_gen: v5e
topology: v5e:2x2
jax: 0.10.0
libtpu: 0.0.40
codegen_flags: <defaults>
</compile_context>

<pallas_src>
from typing import NamedTuple

import jax
import jax.numpy as jnp
from jax.experimental import pallas as pl
from jax.experimental.pallas import tpu as pltpu


def _round_up(x, m):
    return ((x + m - 1) // m) * m


def _cdiv(a, b):
    return -(-a // b)


# ---------------------------------------------------------------------------
# Kernel: out = relu(x @ w1 + b1) @ w2 + b2.
# Grid = (batch tiles [parallel], hiddim chunks [arbitrary, reduction for fc2]).
# ---------------------------------------------------------------------------
def _mlp_kernel(x_ref, w1_ref, b1_ref, w2_ref, b2_ref, out_ref, acc_ref):
    k = pl.program_id(1)

    @pl.when(k == 0)
    def _():
        acc_ref[...] = jnp.zeros_like(acc_ref)

    # fc1 chunk + ReLU: MXU matmul with f32 accumulation, f32 bias add.
    h = jnp.dot(x_ref[...], w1_ref[...], preferred_element_type=jnp.float32)
    h = jnp.maximum(h + b1_ref[...], 0.0)
    # fc2 partial product over this hiddim chunk, accumulated in f32.
    acc_ref[...] += jnp.dot(h.astype(w2_ref.dtype), w2_ref[...],
                            preferred_element_type=jnp.float32)

    @pl.when(k == pl.num_programs(1) - 1)
    def _():
        out_ref[...] = (acc_ref[...] + b2_ref[...]).astype(out_ref.dtype)

    # TODO(synk): dropout path (self.dropout=False in the default config) not
    # implemented; it would use pltpu.prng_seed + pltpu.prng_random_bits.
    # TODO(synk): output_each_layer / LeakyReLU path not implemented (default=False).


class PreparedMLP(NamedTuple):
    w1: jax.Array   # (indim_p, hiddim_p)  mm_dtype
    b1: jax.Array   # (1, hiddim_p)        f32
    w2: jax.Array   # (hiddim_p, outdim_p) mm_dtype
    b2: jax.Array   # (1, outdim_p)        f32
    indim: int
    hiddim: int
    outdim: int


def prepare_mlp_params(w1, b1, w2, b2, compute_dtype=None):
    """One-time pad (to lane-dense multiples of 128) + cast of the weights.

    Hoisted out of the per-call path so repeated inference pays no extra HBM
    traffic re-padding/casting the weight matrices.
    """
    indim, hiddim = w1.shape
    outdim = w2.shape[1]
    if compute_dtype is None:
        # bf16 matmul inputs are MXU-native on v5e/v6e/v7x; accumulation stays f32.
        compute_dtype = jnp.bfloat16 if jnp.dtype(w1.dtype) == jnp.float32 else w1.dtype
    mm_dtype = jnp.dtype(compute_dtype)

    indim_p = _round_up(indim, 128)
    hiddim_p = _round_up(hiddim, 128)
    outdim_p = _round_up(outdim, 128)

    w1_p = jnp.pad(w1, ((0, indim_p - indim), (0, hiddim_p - hiddim))).astype(mm_dtype)
    w2_p = jnp.pad(w2, ((0, hiddim_p - hiddim), (0, outdim_p - outdim))).astype(mm_dtype)
    b1_p = jnp.pad(jnp.reshape(b1, (1, hiddim)),
                   ((0, 0), (0, hiddim_p - hiddim))).astype(jnp.float32)
    b2_p = jnp.pad(jnp.reshape(b2, (1, outdim)),
                   ((0, 0), (0, outdim_p - outdim))).astype(jnp.float32)
    return PreparedMLP(w1_p, b1_p, w2_p, b2_p, indim, hiddim, outdim)


def _vmem_capacity_bytes():
    # Capability probe with a safe (v7x-sized) fallback; never masks kernel errors.
    try:
        return int(pltpu.get_tpu_info().vmem_capacity_bytes)
    except Exception:
        return 64 << 20


def mlp_forward(x, params: PreparedMLP, *, tile_b=256, out_dtype=None):
    """relu(x @ w1 + b1) @ w2 + b2 with pre-padded params (see prepare_mlp_params)."""
    B, indim = x.shape
    assert indim == params.indim, "input feature dim mismatch"
    w1_p, b1_p, w2_p, b2_p = params.w1, params.b1, params.w2, params.b2
    indim_p, hiddim_p = w1_p.shape
    outdim_p = w2_p.shape[1]
    mm_dtype = jnp.dtype(w1_p.dtype)
    out_dtype = jnp.dtype(out_dtype) if out_dtype is not None else jnp.dtype(x.dtype)
    itemsize = mm_dtype.itemsize
    out_itemsize = out_dtype.itemsize

    # ---- batch tiling: sublane-aligned; >=2 batch tiles when possible so v7x's
    #      two TensorCores both get work via the "parallel" axis. -----------------
    sub = 16 if itemsize == 2 else 8
    B_sub = _round_up(B, sub)
    tile_b_cap = min(_round_up(max(tile_b, sub), sub), B_sub)
    nb = _cdiv(B_sub, tile_b_cap)
    if nb == 1 and B_sub >= 2 * sub:
        nb = 2
    tile_b_eff = _round_up(_cdiv(B_sub, nb), sub)
    B_p = nb * tile_b_eff

    x_p = jnp.pad(x, ((0, B_p - B), (0, indim_p - indim))).astype(mm_dtype)

    # ---- VMEM budget & hiddim chunking ------------------------------------------
    vmem_budget = int(_vmem_capacity_bytes() * 0.85)
    fixed_bytes = (
        2 * tile_b_eff * indim_p * itemsize          # double-buffered x tiles
        + 2 * tile_b_eff * outdim_p * out_itemsize   # double-buffered out tiles
        + tile_b_eff * outdim_p * 4                  # f32 accumulator scratch
        + 2 * outdim_p * 4                           # b2 (f32)
    )
    weight_bytes = (indim_p + outdim_p) * hiddim_p * itemsize
    resident_total = (fixed_bytes + weight_bytes + hiddim_p * 4
                      + tile_b_eff * hiddim_p * 4)   # + f32 h temporary

    if resident_total <= vmem_budget:
        hid_chunk = hiddim_p                         # whole weights resident
    else:
        # Stream hiddim in chunks (weights double-buffered along the chunk axis).
        per_h = 2 * (indim_p + outdim_p) * itemsize + tile_b_eff * 4 + 8
        max_chunk = (vmem_budget - fixed_bytes) // per_h
        max_chunk = max(128, min(hiddim_p, (max_chunk // 128) * 128))
        hid_chunk = 128
        c = max_chunk
        while c >= 128:                              # largest 128-multiple divisor
            if hiddim_p % c == 0:
                hid_chunk = c
                break
            c -= 128
    nh = hiddim_p // hid_chunk

    def _footprint(weight_bufs):
        return int(
            fixed_bytes
            + weight_bufs * (indim_p + outdim_p) * hid_chunk * itemsize
            + weight_bufs * hid_chunk * 4
            + tile_b_eff * hid_chunk * 4
        )

    grid = (nb, nh)
    cost = pl.CostEstimate(
        flops=int(2 * B_p * hiddim_p * (indim_p + outdim_p)),
        transcendentals=0,
        bytes_accessed=int(
            B_p * indim_p * itemsize
            + (nb if nh > 1 else 1) * weight_bytes
            + (hiddim_p + outdim_p) * 4
            + B_p * outdim_p * out_itemsize
        ),
    )

    def _call(single_buffer_invariant):
        # Grid-invariant operands gain nothing from double buffering;
        # Buffered(1) halves their VMEM footprint.
        inv_kw = {"pipeline_mode": pl.Buffered(1)} if single_buffer_invariant else {}
        w_kw = inv_kw if nh == 1 else {}
        weight_bufs = 1 if (single_buffer_invariant and nh == 1) else 2
        vmem_limit = min(max(int(1.25 * _footprint(weight_bufs)), 16 << 20), vmem_budget)

        grid_spec = pltpu.PrefetchScalarGridSpec(
            num_scalar_prefetch=0,
            grid=grid,
            in_specs=[
                pl.BlockSpec((tile_b_eff, indim_p), lambda i, k: (i, 0)),       # x tile
                pl.BlockSpec((indim_p, hid_chunk), lambda i, k: (0, k), **w_kw),  # w1
                pl.BlockSpec((1, hid_chunk), lambda i, k: (0, k), **w_kw),        # b1
                pl.BlockSpec((hid_chunk, outdim_p), lambda i, k: (k, 0), **w_kw), # w2
                pl.BlockSpec((1, outdim_p), lambda i, k: (0, 0), **inv_kw),       # b2
            ],
            out_specs=pl.BlockSpec((tile_b_eff, outdim_p), lambda i, k: (i, 0)),
            scratch_shapes=[pltpu.VMEM((tile_b_eff, outdim_p), jnp.float32)],
        )
        return pl.pallas_call(
            _mlp_kernel,
            out_shape=jax.ShapeDtypeStruct((B_p, outdim_p), out_dtype),
            grid_spec=grid_spec,
            compiler_params=pltpu.CompilerParams(
                dimension_semantics=("parallel", "arbitrary"),
                vmem_limit_bytes=vmem_limit,
            ),
            cost_estimate=cost,
        )(x_p, w1_p, b1_p, w2_p, b2_p)

    single_ok = hasattr(pl, "Buffered")
    try:
        out_p = _call(single_ok)
    except TypeError:
        # Only for jax versions whose BlockSpec rejects pipeline_mode; the VMEM
        # limit is recomputed inside _call for double-buffered weights.
        out_p = _call(False)

    return out_p[:B, :params.outdim]


def init_mlp_params(key, indim, hiddim, outdim, dtype=jnp.float32):
    """Deterministic init mimicking nn.Linear's U(-1/sqrt(fan_in), +1/sqrt(fan_in))."""
    k1, k2, k3, k4 = jax.random.split(key, 4)
    bound1 = 1.0 / (indim ** 0.5)
    bound2 = 1.0 / (hiddim ** 0.5)
    w1 = jax.random.uniform(k1, (indim, hiddim), dtype, minval=-bound1, maxval=bound1)
    b1 = jax.random.uniform(k2, (1, hiddim), dtype, minval=-bound1, maxval=bound1)
    w2 = jax.random.uniform(k3, (hiddim, outdim), dtype, minval=-bound2, maxval=bound2)
    b2 = jax.random.uniform(k4, (1, outdim), dtype, minval=-bound2, maxval=bound2)
    return w1, b1, w2, b2


def mlp_reference(x, w1, b1, w2, b2):
    h = jnp.maximum(x @ w1 + b1, 0.0)
    return h @ w2 + b2


if __name__ == "__main__":
    B, indim, hiddim, outdim = 16, 32, 64, 16

    key = jax.random.PRNGKey(0)
    kx, kp = jax.random.split(key)
    x = jax.random.normal(kx, (B, indim), dtype=jnp.float32)
    w1, b1, w2, b2 = init_mlp_params(kp, indim, hiddim, outdim)
    ref = mlp_reference(x, w1, b1, w2, b2)

    # Exact-precision path (f32 MXU inputs): tight check vs the JAX reference.
    params_f32 = prepare_mlp_params(w1, b1, w2, b2, compute_dtype=jnp.float32)
    out_f32 = jax.block_until_ready(mlp_forward(x, params_f32))
    assert out_f32.shape == (B, outdim)
    assert jnp.allclose(out_f32, ref, atol=1e-4, rtol=1e-4), "f32 path mismatch"

    # Default fast path: bf16 MXU inputs, f32 accumulation — tolerance check.
    params_bf16 = prepare_mlp_params(w1, b1, w2, b2)
    out_bf16 = jax.block_until_ready(mlp_forward(x, params_bf16))
    assert out_bf16.shape == (B, outdim)
    assert jnp.allclose(out_bf16, ref, atol=5e-2, rtol=5e-2), "bf16 path mismatch"

    print("KERNEL_OK")
</pallas_src>

<mosaic_0001>
module attributes {stable_mosaic.version = 11 : i64} {
  func.func @_mlp_kernel(%arg0: i32, %arg1: i32, %arg2: memref<8x128xf32, #tpu.memory_space<vmem>>, %arg3: memref<128x128xf32, #tpu.memory_space<vmem>>, %arg4: memref<1x128xf32, #tpu.memory_space<vmem>>, %arg5: memref<128x128xf32, #tpu.memory_space<vmem>>, %arg6: memref<1x128xf32, #tpu.memory_space<vmem>>, %arg7: memref<8x128xf32, #tpu.memory_space<vmem>>, %arg8: memref<8x128xf32, #tpu.memory_space<vmem>>) attributes {dimension_semantics = [#tpu.dimension_semantics<parallel>, #tpu.dimension_semantics<arbitrary>], iteration_bounds = array<i64: 2, 1>, scalar_prefetch = 0 : i64, scratch_operands = 1 : i64, tpu.core_type = #tpu.core_type<tc>, window_params = [{transform_indices = @transform_0, window_bounds = array<i64: 8, 128>}, {pipeline_mode = #tpu.pipeline_mode<synchronous>, transform_indices = @transform_1, window_bounds = array<i64: 128, 128>}, {pipeline_mode = #tpu.pipeline_mode<synchronous>, transform_indices = @transform_2, window_bounds = array<i64: 1, 128>}, {pipeline_mode = #tpu.pipeline_mode<synchronous>, transform_indices = @transform_3, window_bounds = array<i64: 128, 128>}, {pipeline_mode = #tpu.pipeline_mode<synchronous>, transform_indices = @transform_4, window_bounds = array<i64: 1, 128>}, {transform_indices = @transform_5, window_bounds = array<i64: 8, 128>}]} {
    %c0_i32 = arith.constant 0 : i32
    %0 = arith.cmpi eq, %arg1, %c0_i32 : i32
    %1 = arith.extui %0 : i1 to i32
    %c0_i32_0 = arith.constant 0 : i32
    %2 = arith.cmpi ne, %1, %c0_i32_0 : i32
    scf.if %2 {
      %cst_16 = arith.constant 0.000000e+00 : f32
      %19 = vector.broadcast %cst_16 : f32 to vector<8x128xf32>
      %c0_17 = arith.constant 0 : index
      %c0_18 = arith.constant 0 : index
      %20 = vector.load %arg8[%c0_17, %c0_18] : memref<8x128xf32, #tpu.memory_space<vmem>>, vector<8x128xf32>
      tpu.vector_store %arg8[%c0_17, %c0_18], %19 {strides = array<i32>} : memref<8x128xf32, #tpu.memory_space<vmem>>, vector<8x128xf32>,
    } else {
    }
    %c0 = arith.constant 0 : index
    %c0_1 = arith.constant 0 : index
    %3 = vector.load %arg2[%c0, %c0_1] : memref<8x128xf32, #tpu.memory_space<vmem>>, vector<8x128xf32>
    %c0_2 = arith.constant 0 : index
    %c0_3 = arith.constant 0 : index
    %4 = vector.load %arg3[%c0_2, %c0_3] : memref<128x128xf32, #tpu.memory_space<vmem>>, vector<128x128xf32>
    %cst = arith.constant dense<0.000000e+00> : vector<8x128xf32>
    %5 = tpu.matmul %3, %4, %cst {dimension_numbers = #tpu.dot_dimension_numbers<[1], [0], [0], [1], [0, 0, 1, 1], [], []>} : vector<8x128xf32>, vector<128x128xf32>, vector<8x128xf32> -> vector<8x128xf32>
    %c0_4 = arith.constant 0 : index
    %c0_5 = arith.constant 0 : index
    %6 = vector.load %arg4[%c0_4, %c0_5] : memref<1x128xf32, #tpu.memory_space<vmem>>, vector<1x128xf32>
    %7 = vector.broadcast %6 : vector<1x128xf32> to vector<8x128xf32>
    %8 = arith.addf %5, %7 : vector<8x128xf32>
    %cst_6 = arith.constant 0.000000e+00 : f32
    %9 = vector.broadcast %cst_6 : f32 to vector<8x128xf32>
    %10 = arith.maximumf %8, %9 : vector<8x128xf32>
    %c0_7 = arith.constant 0 : index
    %c0_8 = arith.constant 0 : index
    %11 = vector.load %arg8[%c0_7, %c0_8] : memref<8x128xf32, #tpu.memory_space<vmem>>, vector<8x128xf32>
    %c0_9 = arith.constant 0 : index
    %c0_10 = arith.constant 0 : index
    %12 = vector.load %arg5[%c0_9, %c0_10] : memref<128x128xf32, #tpu.memory_space<vmem>>, vector<128x128xf32>
    %cst_11 = arith.constant dense<0.000000e+00> : vector<8x128xf32>
    %13 = tpu.matmul %10, %12, %cst_11 {dimension_numbers = #tpu.dot_dimension_numbers<[1], [0], [0], [1], [0, 0, 1, 1], [], []>} : vector<8x128xf32>, vector<128x128xf32>, vector<8x128xf32> -> vector<8x128xf32>
    %14 = arith.addf %11, %13 : vector<8x128xf32>
    %c0_12 = arith.constant 0 : index
    %c0_13 = arith.constant 0 : index
    %15 = vector.load %arg8[%c0_12, %c0_13] : memref<8x128xf32, #tpu.memory_space<vmem>>, vector<8x128xf32>
    tpu.vector_store %arg8[%c0_12, %c0_13], %14 {strides = array<i32>} : memref<8x128xf32, #tpu.memory_space<vmem>>, vector<8x128xf32>,
    %c0_i32_14 = arith.constant 0 : i32
    %16 = arith.cmpi eq, %arg1, %c0_i32_14 : i32
    %17 = arith.extui %16 : i1 to i32
    %c0_i32_15 = arith.constant 0 : i32
    %18 = arith.cmpi ne, %17, %c0_i32_15 : i32
    scf.if %18 {
      %c0_16 = arith.constant 0 : index
      %c0_17 = arith.constant 0 : index
      %19 = vector.load %arg8[%c0_16, %c0_17] : memref<8x128xf32, #tpu.memory_space<vmem>>, vector<8x128xf32>
      %c0_18 = arith.constant 0 : index
      %c0_19 = arith.constant 0 : index
      %20 = vector.load %arg6[%c0_18, %c0_19] : memref<1x128xf32, #tpu.memory_space<vmem>>, vector<1x128xf32>
      %21 = vector.broadcast %20 : vector<1x128xf32> to vector<8x128xf32>
      %22 = arith.addf %19, %21 : vector<8x128xf32>
      %c0_20 = arith.constant 0 : index
      %c0_21 = arith.constant 0 : index
      %23 = vector.load %arg7[%c0_20, %c0_21] : memref<8x128xf32, #tpu.memory_space<vmem>>, vector<8x128xf32>
      tpu.vector_store %arg7[%c0_20, %c0_21], %22 {strides = array<i32>} : memref<8x128xf32, #tpu.memory_space<vmem>>, vector<8x128xf32>,
    } else {
    }
    return
  }
  func.func @transform_0(%arg0: i32, %arg1: i32) -> (i32, i32) {
    %c0_i32 = arith.constant 0 : i32
    %c0_i32_0 = arith.constant 0 : i32
    return %arg0, %c0_i32 : i32, i32
  }
  func.func @transform_1(%arg0: i32, %arg1: i32) -> (i32, i32) {
    %c0_i32 = arith.constant 0 : i32
    %c0_i32_0 = arith.constant 0 : i32
    return %c0_i32, %arg1 : i32, i32
  }
  func.func @transform_2(%arg0: i32, %arg1: i32) -> (i32, i32) {
    %c0_i32 = arith.constant 0 : i32
    %c0_i32_0 = arith.constant 0 : i32
    return %c0_i32, %arg1 : i32, i32
  }
  func.func @transform_3(%arg0: i32, %arg1: i32) -> (i32, i32) {
    %c0_i32 = arith.constant 0 : i32
    %c0_i32_0 = arith.constant 0 : i32
    return %arg1, %c0_i32 : i32, i32
  }
  func.func @transform_4(%arg0: i32, %arg1: i32) -> (i32, i32) {
    %c0_i32 = arith.constant 0 : i32
    %c0_i32_0 = arith.constant 0 : i32
    %c0_i32_1 = arith.constant 0 : i32
    return %c0_i32, %c0_i32_0 : i32, i32
  }
  func.func @transform_5(%arg0: i32, %arg1: i32) -> (i32, i32) {
    %c0_i32 = arith.constant 0 : i32
    %c0_i32_0 = arith.constant 0 : i32
    return %arg0, %c0_i32 : i32, i32
  }
}

</mosaic_0001>

<bundles_post_ra>
// kernel: tpu_custom_call.1
= control target key start
LH: loop header
LB: loop body
LE: loop exit
PB: predicated region body
PF: predicated region fallthrough
CT: control target
= control target key end

     0   :  { %10 = vsyncpa [#allocation4], 0  ;;  %s1016_s0 = inlined_call_operand.hbm [shape: f32[16,128], index: 0, kind: input, shape index: {}]   ;;  %s1017_s1 = inlined_call_operand.hbm [shape: f32[128,128], index: 1, kind: input, shape index: {}]   ;;  %s1018_s2 = inlined_call_operand.vmem [shape: f32[1,128], index: 2, kind: input, shape index: {}]   ;;  %s1019_s3 = inlined_call_operand.hbm [shape: f32[128,128], index: 3, kind: input, shape index: {}]   ;;  %s1020_s4 = inlined_call_operand.vmem [shape: f32[1,128], index: 4, kind: input, shape index: {}]   ;;  %s1021_s5 = inlined_call_operand.hbm [shape: f32[16,128], index: 5, kind: output, shape index: {}]  }
   0x1   :  { %12 = vsyncpa [#allocation4 + $0x1], 0 }
   0x2   :  { %13 = vsyncpa [#allocation7], 0 }
   0x3   :  { %14 = vsyncpa [#allocation5], 0 }
   0x4   :  { %16 = vsyncpa [#allocation5 + $0x1], 0  ;;  %s859_s18 = smov 0   ;;  %s861_s19 = smov 0  }
   0x5   :  { %s863_s20 = smov 0   ;;  %s865_s21 = smov 0  }
   0x6   :  { %s867_s22 = smov 0   ;;  %s869_s23 = smov 0  }
   0x7 LB: > { %s542_s24 = sadd.s32 4294967295, %s823_s23   ;;  %p544_p0 = scmp.ge.s32.totalorder %s823_s23, 1  ;;  %s823_s23 = sphi %s869_s23, %s22_s23   ;;  %s819_s22 = sphi %s867_s22, %s1031_s22   ;;  %s815_s21 = sphi %s865_s21, %s1030_s21   ;;  %s811_s20 = sphi %s863_s20, %s1029_s20   ;;  %s807_s19 = sphi %s861_s19, %s1028_s19   ;;  %s803_s18 = sphi %s859_s18, %s1027_s18  }
   0x8   : > { %p893_p1 = scmp.eq.s32.totalorder %s542_s24, 0  ;;  %p190_p2 = scmp.lt.s32.totalorder %s823_s23, 3 }
   0x9   : > { %s203_s28 = sshll.u32 %s1017_s1, 4  ;;  %s825_s30 = smov [#allocation6]   ;;  %s204_s28 = int_to_ptr.hbm [resolvable:$true] %s203_s28 }
   0xa   : > { %p901_p3 = pnand %p544_p0, %p190_p2  ;;  %s205_s6 = sshll.u32 %s825_s30, 4  ;;  %s206_s6 = int_to_ptr.vmem [resolvable:$true] %s205_s6 }
   0xb   : > { %p548_p6 = scmp.ge.s32.totalorder %s823_s23, 2  ;;  %s226_s9 = sshll.u32 %s1019_s3, 4  ;;  %s227_s9 = int_to_ptr.hbm [resolvable:$true] %s226_s9 }
   0xc   : > { %p572_p4 = pneg %p901_p3  ;;  %s826_s10 = smov 128  }
   0xd   : > { %s827_s11 = smov 8   ;;  %s828_s12 = smov [#allocation8]  }
   0xe   : > { %p573_p5 = pnand %p572_p4, %p893_p1  ;;  %s228_s13 = sshll.u32 %s828_s12, 4  ;;  %s229_s13 = int_to_ptr.vmem [resolvable:$true] %s228_s13 }
   0xf   : > { %s34_s14 = sadd.s32 1, %s819_s22  ;;  %s543_s15 = sadd.s32 4294967294, %s823_s23  }
  0x10   : > { %575 = dma.hbm_to_vmem [thread:$0]  (!%p573_p5), %s204_s28, 2048, %s206_s6, [#allocation7], %s826_s10, %s826_s10, %s827_s11  }
  0x11   : > { %578 = dma.hbm_to_vmem [thread:$0]  (!%p573_p5), %s227_s9, 2048, %s229_s13, [#allocation7], %s826_s10, %s826_s10, %s827_s11  }
  0x12   : > { %p36_p7 = scmp.ge.s32.totalorder %s34_s14, 2  ;;  %s41_s16 = sadd.s32 1, %s811_s20 }
  0x13   : > { %p48_p8 = scmp.ne.s32.totalorder %s811_s20, %s807_s19  ;;  %p49_p9 = scmp.eq.s32.totalorder %s823_s23, 0 }
  0x14   : > { %s1033_s14 = smov (%p36_p7, %s34_s14), 0  ;;  %p54_p10 = scmp.ne.s32.totalorder %s807_s19, %s803_s18 }
  0x15   : > { %s38_s17 = ssub.s32 %s819_s22, %s1033_s14  ;;  %p177_p11 = scmp.eq.s32.totalorder %s542_s24, 1 }
  0x16   : > { %p39_p12 = scmp.eq.s32.totalorder %s38_s17, 0  ;;  %p929_p13 = por %p893_p1, %p54_p10 }
  0x17   : > { %p933_p0 = por %p177_p11, %p48_p8  ;;  %p183_p2 = scmp.eq.s32.totalorder %s543_s15, 1 }
  0x18   : > { %s938_s28 = scalar_select %p39_p12, %s811_s20, %s41_s16  }
  0x19   : > { %p50_p4 = por %p49_p9, %p48_p8  ;;  %p940_p5 = por %p183_p2, %p54_p10 }
  0x1a   : > { %s245_s6 = sand.u32 1, %s811_s20   ;;  %s550_s24 = sshll.u32 %s819_s22, 3 }
  0x1b   : > { %p589_p7 = scmp.lt.s32.totalorder %s823_s23, 2  ;;  %s549_s7 = sshll.u32 %s245_s6, 3 }
  0x1c   : > { %s253_s10 = scalar_lea.hbm %s1016_s0, %s550_s24  ;;  %s249_s12 = scalar_lea.vmem [#allocation3], %s549_s7 }
  0x1d   : > { %s255_s11 = sshll.u32 %s253_s10, 4  ;;  %s257_s13 = sshll.u32 %s249_s12, 4  ;;  %s256_s11 = int_to_ptr.hbm [resolvable:$true] %s255_s11  ;;  %s258_s13 = int_to_ptr.vmem [resolvable:$true] %s257_s13 }
  0x1e   : > { %p580_p11 = pnand %p589_p7, %p50_p4  ;;  %s246_s15 = scalar_lea.sflag [#allocation4], %s245_s6 }
  0x1f   : > { %266 = sbr.rel (%p901_p3) target bundleno = 332 (0x14c), region = 40  ;;  %s953_s16 = sand.u32 (!%p901_p3), 1, %s807_s19  }
  0x20   : > { %582 = dma.hbm_to_vmem [thread:$0]  (!%p580_p11), %s256_s11, 128, %s258_s13, %s246_s15  }
  0x21   : > { %s552_s17 = sshll.u32 (!%p901_p3), %s953_s16, 3  ;;  %s269_s24 = scalar_lea.sflag (!%p901_p3), [#allocation4], %s953_s16 }
  0x22   : > { %s959_s7 = scalar_lea.vmem (!%p901_p3), [#allocation3], %s552_s17 }
  0x24   : > { %790 = dma.done.wait (%p929_p13), %s269_s24, 128  }
  0x25   : > { %792 = vsyncadd (%p929_p13), %s269_s24, 4294967168 }
  0x26   : > { %794 = dma.done.wait (%p893_p1), [#allocation7], 4096  }
  0x27   : > { %796 = vsyncadd (%p893_p1), [#allocation7], 4294963200  ;;  %v338_v0 = vld [vmem:[#allocation6 + $0x78] sm:$0xff]  ;;  %v337_v1 = vld [vmem:[#allocation6 + $0x70] sm:$0xff]  ;;  %s557_s26 = sshll.u32 %s815_s21, 3  ;;  %s312_s12 = scalar_lea.vmem [#allocation9], %s552_s17 }
  0x28   : > { %343 = vmatpush.msra.mxu0 %v338_v0  ;;  %v336_v2 = vld [vmem:[#allocation6 + $0x68] sm:$0xff]  ;;  %v335_v3 = vld [vmem:[#allocation6 + $0x60] sm:$0xff]  ;;  %v380_v4 = vld [vmem:[#allocation8 + $0x78] sm:$0xff]  ;;  %s424_s9 = scalar_lea.hbm %s1021_s5, %s557_s26  ;;  %s426_s13 = sshll.u32 %s312_s12, 4  ;;  %s427_s13 = int_to_ptr.vmem [resolvable:$true] %s426_s13 }
  0x29   : > { %v334_v5 = vld [vmem:[#allocation6 + $0x58] sm:$0xff]  ;;  %381 = vmatpush.msra.mxu1 %v380_v4  ;;  %v379_v6 = vld [vmem:[#allocation8 + $0x70] sm:$0xff]  ;;  %v378_v7 = vld [vmem:[#allocation8 + $0x68] sm:$0xff]  ;;  %s428_s15 = sshll.u32 %s424_s9, 4  ;;  %s414_s24 = scalar_lea.sflag [#allocation5], %s953_s16  ;;  %s429_s15 = int_to_ptr.hbm [resolvable:$true] %s428_s15 }
  0x2a   : > { %344 = vmatpush.msra.mxu0 %v337_v1  ;;  %v333_v8 = vld [vmem:[#allocation6 + $0x50] sm:$0xff]  ;;  %v377_v9 = vld [vmem:[#allocation8 + $0x60] sm:$0xff]  ;;  %v332_v10 = vld [vmem:[#allocation6 + $0x48] sm:$0xff]  ;;  %s751_s21 = sshra.s32 %s429_s15, 4  ;;  %s757_s26 = scalar_lea.hbm %s1021_s5, 16  ;;  %s752_s21 = int_to_ptr.hbm [resolvable:$true] %s751_s21 }
  0x2b   : > { %382 = vmatpush.msra.mxu1 %v379_v6  ;;  %v376_v11 = vld [vmem:[#allocation8 + $0x58] sm:$0xff]  ;;  %v331_v12 = vld [vmem:[#allocation6 + $0x40] sm:$0xff]  ;;  %v375_v13 = vld [vmem:[#allocation8 + $0x50] sm:$0xff]  ;;  %p758_p9 = scmp.lt.s32.totalorder %s752_s21, %s1021_s5 }
  0x2c   : > { %345 = vmatpush.msra.mxu0 %v336_v2  ;;  %v330_v14 = vld [vmem:[#allocation6 + $0x38] sm:$0xff]  ;;  %v374_v15 = vld [vmem:[#allocation8 + $0x48] sm:$0xff]  ;;  %v329_v16 = vld [vmem:[#allocation6 + $0x30] sm:$0xff] }
  0x2d   : > { %383 = vmatpush.msra.mxu1 %v378_v7  ;;  %v373_v17 = vld [vmem:[#allocation8 + $0x40] sm:$0xff]  ;;  %v328_v18 = vld [vmem:[#allocation6 + $0x28] sm:$0xff]  ;;  %v372_v19 = vld [vmem:[#allocation8 + $0x38] sm:$0xff] }
  0x2e   : > { %346 = vmatpush.msra.mxu0 %v335_v3  ;;  %v327_v20 = vld [vmem:[#allocation6 + $0x20] sm:$0xff]  ;;  %v371_v21 = vld [vmem:[#allocation8 + $0x30] sm:$0xff]  ;;  %v326_v22 = vld [vmem:[#allocation6 + $0x18] sm:$0xff] }
  0x2f   : > { %384 = vmatpush.msra.mxu1 %v377_v9  ;;  %v370_v23 = vld [vmem:[#allocation8 + $0x28] sm:$0xff]  ;;  %v325_v24 = vld [vmem:[#allocation6 + $0x10] sm:$0xff]  ;;  %v369_v25 = vld [vmem:[#allocation8 + $0x20] sm:$0xff] }
  0x30   : > { %347 = vmatpush.msra.mxu0 %v334_v5  ;;  %v324_v26 = vld [vmem:[#allocation6 + $0x8] sm:$0xff]  ;;  %v368_v27 = vld [vmem:[#allocation8 + $0x18] sm:$0xff]  ;;  %v323_v28 = vld [vmem:[#allocation6] sm:$0xff] }
  0x31   : > { %385 = vmatpush.msra.mxu1 %v376_v11  ;;  %v322_v29 = vld [vmem:[%s959_s7] sm:$0xff]  ;;  %v366_v31 = vld [vmem:[#allocation8 + $0x8] sm:$0xff]  ;;  %v365_v32 = vld [vmem:[#allocation8] sm:$0xff]  ;;  %s753_s7 = scalar_lea.hbm %s752_s21, 8 }
  0x32   : > { %348 = vmatpush.msra.mxu0 %v333_v8  ;;  %v367_v30 = vld [vmem:[#allocation8 + $0x10] sm:$0xff]  ;;  %p754_p1 = scmp.ne.s32.totalorder %s752_s21, %s753_s7  ;;  %p759_p10 = scmp.lt.s32.totalorder %s757_s26, %s753_s7 }
  0x33   : > { %386 = vmatpush.msra.mxu1 %v375_v13  ;;  %v645_v33 = vld [vmem:[%s1018_s2] ss:$0 sm:$0xff] }
  0x34   : > { %349 = vmatpush.msra.mxu0 %v332_v10  ;;  %v646_v37 = vld [vmem:[%s1020_s4] ss:$0 sm:$0xff]  ;;  %p755_p3 = pnand %p754_p1, %p933_p0  ;;  %p760_p12 = por %p759_p10, %p758_p9 }
  0x35   : > { %387 = vmatpush.msra.mxu1 %v374_v15 }
  0x36   : > { %350 = vmatpush.msra.mxu0 %v331_v12  ;;  %p756_p8 = pneg %p755_p3 }
  0x37   : > { %388 = vmatpush.msra.mxu1 %v373_v17 }
  0x38   : > { %351 = vmatpush.msra.mxu0 %v330_v14  ;;  %p761_p13 = pnand %p760_p12, %p756_p8 }
  0x39   : > { %389 = vmatpush.msra.mxu1 %v372_v19 }
  0x3a   : > { %352 = vmatpush.msra.mxu0 %v329_v16 }
  0x3b   : > { %390 = vmatpush.msra.mxu1 %v371_v21 }
  0x3c   : > { %353 = vmatpush.msra.mxu0 %v328_v18 }
  0x3d   : > { %391 = vmatpush.msra.mxu1 %v370_v23 }
  0x3e   : > { %354 = vmatpush.msra.mxu0 %v327_v20 }
  0x3f   : > { %392 = vmatpush.msra.mxu1 %v369_v25 }
  0x40   : > { %355 = vmatpush.msra.mxu0 %v326_v22 }
  0x41   : > { %393 = vmatpush.msra.mxu1 %v368_v27 }
  0x42   : > { %356 = vmatpush.msra.mxu0 %v325_v24 }
  0x43   : > { %394 = vmatpush.msra.mxu1 %v367_v30 }
  0x44   : > { %357 = vmatpush.msra.mxu0 %v324_v26 }
  0x45   : > { %395 = vmatpush.msra.mxu1 %v366_v31 }
  0x46   : > { %358 = vmatpush.msra.mxu0 %v323_v28 }
  0x47   : > { %359 = vmatmul.f32.vlgmr.msra.gmra.mxu0 %v322_v29  ;;  %396 = vmatpush.msra.mxu1 %v365_v32 }
  0xc4   : > { %v360_v34 = vpop.f32.mrf.mxu0 }
  0xc5   : > { %v361_v35 = vadd.f32 %v645_v33, %v360_v34 }
  0xc7   : > { %v363_v36 = vmax.f32 %v361_v35, 0.0 }
  0xc9   : > { %397 = vmatmul.f32.vlgmr.msra.gmra.mxu1 %v363_v36 }
 0x146   : > { %v398_v38 = vpop.f32.mrf.mxu1 }
 0x147   : > { %v411_v39 = vadd.f32 %v646_v37, %v398_v38 }
 0x149   : > { %412 = vst [vmem:[%s312_s12] sm:$0xff] %v411_v39 }
 0x14a   : > { %764 = shalt.err (!%p761_p13)
}
 0x14b   : > { %570 = dma.vmem_to_hbm [thread:$0]  (%p933_p0), %s427_s13, 128, %s429_s15, %s414_s24  }
 0x14c PF: > { %s440_s16 = sand.u32 1, %s803_s18   ;;  %p584_p2 = pnand %p548_p6, %p940_p5 }
 0x14d   : > { %s441_s8 = scalar_lea.sflag [#allocation5], %s440_s16 }
 0x14e   : > { %p585_p4 = pneg %p584_p2 }
 0x150   : > { %798 = dma.done.wait (%p585_p4), %s441_s8, 128  }
 0x151   : > { %800 = vsyncadd (%p585_p4), %s441_s8, 4294967168  ;;  %s22_s23 = sadd.s32 1, %s823_s23   ;;  %s1027_s18 = smov %s807_s19 }
 0x152   : > { %p19_p7 = scmp.ge.s32.totalorder %s22_s23, 4   ;;  %s1028_s19 = smov %s811_s20 }
 0x153   : > { %s1029_s20 = smov %s938_s28  ;;  %s1030_s21 = smov %s819_s22 }
 0x154   : > { %s1031_s22 = smov %s1033_s14  ;;  %21 = sbr.rel (!%p19_p7) target bundleno = 7 (0x7), region = 106 }
 0x159   :  { %447 = vsyncpa [#allocation4], 1 }
 0x15a   :  { %449 = vsyncpa [#allocation4 + $0x1], 1 }
 0x15b   :  { %450 = vsyncpa [#allocation7], 1 }
 0x15c   :  { %451 = vsyncpa [#allocation5], 1 }
 0x15d   :  { %453 = vsyncpa [#allocation5 + $0x1], 1 }

</bundles_post_ra>
